<compile_context>
chip_gen: v6e
topology: v6e:2x2x1
jax: 0.10.0
libtpu: 0.0.40
codegen_flags: <defaults>
</compile_context>

<pallas_src>
import jax
import jax.numpy as jnp
from jax import lax
from jax.experimental import pallas as pl
from jax.experimental.pallas import tpu as pltpu


def _head_kernel(x_ref, wqkv_ref, o_ref):
    # x_ref: (B*T, C)   wqkv_ref: (C, 3H)   o_ref: (B, T, H)
    B, T, H = o_ref.shape

    x = x_ref[...]
    w = wqkv_ref[...]

    # Fused QKV projection for the whole batch: one MXU matmul, f32 accumulate.
    qkv = jnp.dot(x, w, preferred_element_type=jnp.float32)       # (B*T, 3H) f32
    qkv = qkv.reshape(B, T, 3 * H)

    scale = jnp.float32(H) ** jnp.float32(-0.5)
    q = qkv[..., 0 * H:1 * H] * scale     # fold scale into q: T*H work, not T*T
    k = qkv[..., 1 * H:2 * H]
    v = qkv[..., 2 * H:3 * H]

    # If the caller feeds bf16 x / weights, feed the MXU bf16 operands too
    # (softmax below stays f32 regardless).  For f32 inputs these are no-ops.
    mxu_dtype = x_ref.dtype

    # scores = q @ k^T, batched over B, contraction over head dim (no k.T temp).
    scores = jnp.einsum(
        "bqh,bkh->bqk",
        q.astype(mxu_dtype), k.astype(mxu_dtype),
        preferred_element_type=jnp.float32,
    )                                                              # (B, T, T) f32

    # Causal mask.  Every row keeps its diagonal unmasked, so -inf is NaN-safe
    # here; if T is ever padded, switch to a large finite negative instead.
    row = lax.broadcasted_iota(jnp.int32, (T, T), 0)
    col = lax.broadcasted_iota(jnp.int32, (T, T), 1)
    scores = jnp.where((col <= row)[None, :, :], scores, jnp.float32(-jnp.inf))

    # Numerically stable softmax in f32; reciprocal routed to the EUP slot.
    m = jnp.max(scores, axis=-1, keepdims=True)
    e = jnp.exp(scores - m)
    denom = jnp.sum(e, axis=-1, keepdims=True)
    attn = e * pl.reciprocal(denom, approx=True)

    # Dropout: inference mode -> identity.
    # TODO(synk): training-mode attention dropout (pltpu.prng_random_bits) not implemented.

    out = jnp.einsum(
        "bqk,bkh->bqh",
        attn.astype(mxu_dtype), v.astype(mxu_dtype),
        preferred_element_type=jnp.float32,
    )                                                              # (B, T, H) f32
    o_ref[...] = out.astype(o_ref.dtype)


@jax.jit
def head_forward(x, wq, wk, wv):
    """x: (B, T, C); wq/wk/wv: (C, H)  ->  (B, T, H).

    Matches PyTorch Head.forward in eval mode; weights are stored (C, H) so the
    projection is x @ w (i.e. nn.Linear's (H, C) weight transposed).
    """
    B, T, C = x.shape
    H = wq.shape[1]

    # Fuse the three projection weights into one (C, 3H) matrix: [q | k | v].
    wqkv = jnp.concatenate([wq, wk, wv], axis=1)
    # Flatten batch & sequence so the fused projection is a single 2-D matmul.
    x_flat = x.reshape(B * T, C)

    # Whole problem in a single kernel invocation: no grid; every operand is a
    # full-array VMEM block (trivially satisfies the (8,128) block rule).
    #
    # TODO(synk): at realistic sizes, reintroduce (a) a "parallel" batch/head/
    #   query-tile grid axis so both v7x TensorCores are used, and (b) an
    #   "arbitrary" KV-tile axis with online-softmax scratch (flash-style) so
    #   the (T,T) scores never materialize and VMEM stays bounded on v7x.
    # NOTE: the output last dim is head_size=16 (<128 lanes -> masked stores);
    #   the real fix is fusing all heads at the multi-head layer level so the
    #   output lane dim becomes n_heads*H >= 128 — out of scope for one Head.
    return pl.pallas_call(
        _head_kernel,
        out_shape=jax.ShapeDtypeStruct((B, T, H), x.dtype),
        in_specs=[
            pl.BlockSpec(memory_space=pltpu.MemorySpace.VMEM),
            pl.BlockSpec(memory_space=pltpu.MemorySpace.VMEM),
        ],
        out_specs=pl.BlockSpec(memory_space=pltpu.MemorySpace.VMEM),
    )(x_flat, wqkv)


def head_reference(x, wq, wk, wv):
    """Pure-JAX reference matching the PyTorch forward (eval mode)."""
    q = x @ wq
    k = x @ wk
    v = x @ wv
    scale = k.shape[-1] ** -0.5
    scores = jnp.einsum("btd,bsd->bts", q, k) * scale
    T = x.shape[1]
    tril = jnp.tril(jnp.ones((T, T), dtype=bool))
    scores = jnp.where(tril, scores, -jnp.inf)
    attn = jax.nn.softmax(scores, axis=-1)
    return jnp.einsum("bts,bsd->btd", attn, v)


if __name__ == "__main__":
    # config: embedding_dim=32, block_size(=seq)=8, head_size=16, batch=2
    B, T, C, H = 2, 8, 32, 16

    key = jax.random.PRNGKey(0)
    kx, kq, kk, kv = jax.random.split(key, 4)

    x = jax.random.normal(kx, (B, T, C), dtype=jnp.float32)
    # deterministic Linear-style init (uniform +/- 1/sqrt(C)), stored as (C, H)
    bound = 1.0 / (C ** 0.5)
    wq = jax.random.uniform(kq, (C, H), minval=-bound, maxval=bound, dtype=jnp.float32)
    wk = jax.random.uniform(kk, (C, H), minval=-bound, maxval=bound, dtype=jnp.float32)
    wv = jax.random.uniform(kv, (C, H), minval=-bound, maxval=bound, dtype=jnp.float32)

    out = head_forward(x, wq, wk, wv)
    jax.block_until_ready(out)

    ref = head_reference(x, wq, wk, wv)
    assert out.shape == (B, T, H)
    # Slightly looser tolerance: softmax denominator uses the EUP approximate
    # reciprocal (relative error ~1e-3-1e-4), everything else is f32.
    assert jnp.allclose(out, ref, atol=5e-3, rtol=5e-3), "mismatch vs reference"

    print("KERNEL_OK")
</pallas_src>

<mosaic_0001>
module attributes {stable_mosaic.version = 11 : i64} {
  func.func @_head_kernel(%arg0: memref<16x32xf32, #tpu.memory_space<vmem>>, %arg1: memref<32x48xf32, #tpu.memory_space<vmem>>, %arg2: memref<2x8x16xf32, #tpu.memory_space<vmem>>) attributes {dimension_semantics = [], scalar_prefetch = 0 : i64, scratch_operands = 0 : i64, tpu.core_type = #tpu.core_type<tc>} {
    %c0 = arith.constant 0 : index
    %c0_0 = arith.constant 0 : index
    %0 = vector.load %arg0[%c0, %c0_0] : memref<16x32xf32, #tpu.memory_space<vmem>>, vector<16x32xf32>
    %c0_1 = arith.constant 0 : index
    %c0_2 = arith.constant 0 : index
    %1 = vector.load %arg1[%c0_1, %c0_2] : memref<32x48xf32, #tpu.memory_space<vmem>>, vector<32x48xf32>
    %cst = arith.constant dense<0.000000e+00> : vector<16x48xf32>
    %2 = tpu.matmul %0, %1, %cst {dimension_numbers = #tpu.dot_dimension_numbers<[1], [0], [0], [1], [0, 0, 1, 1], [], []>} : vector<16x32xf32>, vector<32x48xf32>, vector<16x48xf32> -> vector<16x48xf32>
    %3 = vector.shape_cast %2 : vector<16x48xf32> to vector<2x8x48xf32>
    %cst_3 = arith.constant 1.600000e+01 : f32
    %cst_4 = arith.constant -5.000000e-01 : f32
    %4 = math.powf %cst_3, %cst_4 : f32
    %5 = vector.extract_strided_slice %3 {offsets = [0, 0, 0], sizes = [2, 8, 16], strides = [1, 1, 1]} : vector<2x8x48xf32> to vector<2x8x16xf32>
    %6 = vector.broadcast %4 : f32 to vector<2x8x16xf32>
    %7 = arith.mulf %5, %6 : vector<2x8x16xf32>
    %8 = vector.extract_strided_slice %3 {offsets = [0, 0, 16], sizes = [2, 8, 16], strides = [1, 1, 1]} : vector<2x8x48xf32> to vector<2x8x16xf32>
    %9 = vector.extract_strided_slice %3 {offsets = [0, 0, 32], sizes = [2, 8, 16], strides = [1, 1, 1]} : vector<2x8x48xf32> to vector<2x8x16xf32>
    "tpu.trace_start"() <{level = 10 : i32, message = "bqh,bkh->bqk"}> : () -> ()
    %cst_5 = arith.constant dense<0.000000e+00> : vector<2x8x8xf32>
    %10 = tpu.matmul %7, %8, %cst_5 {dimension_numbers = #tpu.dot_dimension_numbers<[2], [2], [1], [1], [0, 0, 0, 1, 1, 1], [0], [0]>} : vector<2x8x16xf32>, vector<2x8x16xf32>, vector<2x8x8xf32> -> vector<2x8x8xf32>
    "tpu.trace_stop"() : () -> ()
    %11 = tpu.iota {dimensions = array<i32: 0>} : vector<8x8xi32>
    %12 = tpu.iota {dimensions = array<i32: 1>} : vector<8x8xi32>
    %13 = arith.cmpi sle, %12, %11 : vector<8x8xi32>
    %14 = vector.shape_cast %13 : vector<8x8xi1> to vector<1x8x8xi1>
    %cst_6 = arith.constant 0xFF800000 : f32
    %15 = vector.shape_cast %14 : vector<1x8x8xi1> to vector<1x8x8xi1>
    %16 = vector.broadcast %15 : vector<1x8x8xi1> to vector<2x8x8xi1>
    %17 = vector.broadcast %cst_6 : f32 to vector<2x8x8xf32>
    %18 = arith.select %16, %10, %17 : vector<2x8x8xi1>, vector<2x8x8xf32>
    %cst_7 = arith.constant dense<0xFF800000> : vector<2x8xf32>
    %19 = vector.multi_reduction <maximumf>, %18, %cst_7 [2] : vector<2x8x8xf32> to vector<2x8xf32>
    %20 = vector.shape_cast %19 : vector<2x8xf32> to vector<2x8x1xf32>
    %21 = vector.broadcast %20 : vector<2x8x1xf32> to vector<2x8x8xf32>
    %22 = arith.subf %18, %21 : vector<2x8x8xf32>
    %23 = math.exp %22 : vector<2x8x8xf32>
    %cst_8 = arith.constant dense<0.000000e+00> : vector<2x8xf32>
    %24 = vector.multi_reduction <add>, %23, %cst_8 [2] : vector<2x8x8xf32> to vector<2x8xf32>
    %25 = vector.shape_cast %24 : vector<2x8xf32> to vector<2x8x1xf32>
    %26 = tpu.reciprocal %25 {approx = true} : vector<2x8x1xf32> -> vector<2x8x1xf32>
    %27 = vector.broadcast %26 : vector<2x8x1xf32> to vector<2x8x8xf32>
    %28 = arith.mulf %23, %27 : vector<2x8x8xf32>
    "tpu.trace_start"() <{level = 10 : i32, message = "bqk,bkh->bqh"}> : () -> ()
    %cst_9 = arith.constant dense<0.000000e+00> : vector<2x8x16xf32>
    %29 = tpu.matmul %28, %9, %cst_9 {dimension_numbers = #tpu.dot_dimension_numbers<[2], [1], [1], [2], [0, 0, 0, 1, 1, 2], [0], [0]>} : vector<2x8x8xf32>, vector<2x8x16xf32>, vector<2x8x16xf32> -> vector<2x8x16xf32>
    "tpu.trace_stop"() : () -> ()
    %c0_10 = arith.constant 0 : index
    %c0_11 = arith.constant 0 : index
    %c0_12 = arith.constant 0 : index
    %30 = vector.load %arg2[%c0_10, %c0_11, %c0_12] : memref<2x8x16xf32, #tpu.memory_space<vmem>>, vector<2x8x16xf32>
    tpu.vector_store %arg2[%c0_10, %c0_11, %c0_12], %29 {strides = array<i32>} : memref<2x8x16xf32, #tpu.memory_space<vmem>>, vector<2x8x16xf32>,
    return
  }
}

</mosaic_0001>

<bundles_post_ra>
// kernel: head_forward.1
= control target key start
LH: loop header
LB: loop body
LE: loop exit
PB: predicated region body
PF: predicated region fallthrough
CT: control target
= control target key end

     0   :  { %vm18_vm0 = vcmask 261120   ;;  %s610_s0 = inlined_call_operand.vmem [shape: f32[16,32], index: 0, kind: input, shape index: {}]   ;;  %s611_s1 = inlined_call_operand.vmem [shape: f32[32,48], index: 1, kind: input, shape index: {}]   ;;  %s612_s2 = inlined_call_operand.hbm [shape: f32[2,8,16], index: 2, kind: output, shape index: {}]  }
   0x1   :  { %v17_v0 = vld [vmem:[%s611_s1 + $0x18] sm:$0xff]  ;;  %v16_v1 = vld [vmem:[%s611_s1 + $0x10] sm:$0xff]  ;;  %v12_v2 = vld [vmem:[%s610_s0] sm:$0xff] }
   0x2   :  { %483 = vmatprep.subr.mxu0 %v17_v0  ;;  %v15_v3 = vld [vmem:[%s611_s1 + $0x8] sm:$0xff]  ;;  %491 = vmatprep.mubr.msk.f32.mxu0 %vm18_vm0, %v12_v2 }
   0x3   :  { %484 = vmatpush3.msra.mxu0 %v17_v0 }
   0x4   :  { %7 = vsyncpa [#allocation3], 0  ;;  %485 = vmatprep.subr.mxu0 %v16_v1  ;;  %v14_v4 = vld [vmem:[%s611_s1] sm:$0xff]  ;;  %v13_v5 = vld [vmem:[%s610_s0 + $0x8] sm:$0xff]  ;;  %v551_v6 = vmov 0.0   ;;  %vm552_vm1 = vmmov 0   ;;  %v259_v13 = vlaneseq }
   0x5   :  { %486 = vmatpush3.msra.mxu0 %v16_v1  ;;  %494 = vmatprep.subr.mxu1 %v551_v6  ;;  %s553_s1 = smov 112   ;;  %vm105_vm2 = vcmask 130048   ;;  %vm268_vm4 = vcmask 64512   ;;  %s554_s0 = smov 96  }
   0x6   :  { %487 = vmatprep.subr.mxu0 %v15_v3  ;;  %496 = vmatprep.mubr.msk.f32.mxu1 %vm552_vm1, %v551_v6  ;;  %v260_v14 = vshrl.u32 %v259_v13, 7  ;;  %v262_v15 = vand.u32 127, %v259_v13  ;;  %s555_s21 = smov [#allocation2]  }
   0x7   :  { %488 = vmatpush3.msra.mxu0 %v15_v3  ;;  %s450_s22 = sshll.u32 %s555_s21, 4  ;;  %s451_s22 = int_to_ptr.vmem [resolvable:$true] %s450_s22 }
   0x8   :  { %489 = vmatprep.subr.mxu0 %v14_v4  ;;  %vm263_vm3 = vcmp.le.s32.totalorder %v262_v15, %v260_v14  ;;  %s529_s23 = scalar_lea.vmem %s451_s22, 256  ;;  %p534_p1 = scmp.lt.s32.totalorder %s451_s22, %s451_s22 }
   0x9   :  { %490 = vmatpush3.msra.mxu0 %v14_v4  ;;  %p530_p0 = scmp.ne.s32.totalorder %s451_s22, %s529_s23  ;;  %p535_p2 = scmp.lt.s32.totalorder %s529_s23, %s529_s23 }
   0xa   :  { %492 = vmatmul.mubr.msk.f32.vlgmr.msra.gmra.mxu0 %vm18_vm0, %v13_v5  ;;  %504 = vmatprep.subr.mxu0 %v551_v6 }
   0xb   :  { %506 = vmatprep.mubr.msk.f32.mxu0 %vm552_vm1, %v551_v6  ;;  %p536_p3 = por %p535_p2, %p534_p1 }
   0xd   :  { %p537_p4 = pnand %p536_p3, %p530_p0 }
  0xca   :  { %v493_v7 = vpop.f32.mrf.mxu0 }
  0xcb   :  { %v101_v12 = vmul.f32 0.25, %v493_v7 }
  0xcc   :  { %v91_v8 = vpop.f32.mrf.mxu0 }
  0xcd   :  { %103 = vrot.lane.b32.xlu0 %v91_v8, %s553_s1  ;;  %v100_v10 = vmul.f32 0.25, %v91_v8 }
  0xd1   :  { %182 = vrot.lane.b32.xlu0 %v493_v7, %s553_s1 }
 0x13f   :  { %v104_v9 = vpop.permute.xlu0 %103 }
 0x140   :  { %495 = vmatpush3.xpose.msk.msra.mxu1 %vm105_vm2, %v104_v9 }
 0x141   :  { %499 = vmatprep.subr.mxu1 %v551_v6 }
 0x143   :  { %v183_v11 = vpop.permute.xlu0 %182  ;;  %497 = vmatmul.mubr.msk.f32.vlgmr.msra.gmra.mxu1 %vm105_vm2, %v100_v10 }
 0x144   :  { %500 = vmatpush3.xpose.msk.msra.mxu1 %vm105_vm2, %v183_v11  ;;  %501 = vmatprep.mubr.msk.f32.mxu1 %vm552_vm1, %v551_v6 }
 0x145   :  { %509 = vmatprep.subr.mxu1 %v551_v6 }
 0x147   :  { %502 = vmatmul.mubr.msk.f32.vlgmr.msra.gmra.mxu1 %vm105_vm2, %v101_v12 }
 0x148   :  { %511 = vmatprep.mubr.msk.f32.mxu1 %vm552_vm1, %v551_v6 }
 0x203   :  { %v177_v16 = vpop.f32.mrf.mxu1 }
 0x204   :  { %v266_v17 = vsel %vm263_vm3, %v177_v16, -inf }
 0x205   :  { %v498_v18 = vpop.f32.mrf.mxu1  ;;  %v269_v19 = vsel %vm268_vm4, %v266_v17, -inf }
 0x206   :  { %270 = vmax.xlane.f32.xlu1 %v269_v19 }
 0x207   :  { %v255_v20 = vpop.f32.mrf.mxu1 }
 0x208   :  { %v267_v21 = vsel %vm263_vm3, %v255_v20, -inf }
 0x209   :  { %v503_v22 = vpop.f32.mrf.mxu1  ;;  %v272_v23 = vsel %vm268_vm4, %v267_v21, -inf }
 0x20a   :  { %273 = vmax.xlane.f32.xlu1 %v272_v23 }
 0x21b   :  { %291 = vrot.lane.b32.xlu1 %v91_v8, %s554_s0 }
 0x28f   :  { %v271_v24 = vpop.xlane.xlu1 %270 }
 0x290   :  { %v275_v25 = vsub.f32 %v266_v17, %v271_v24 }
 0x292   :  { %v277_v26 = vmul.f32 1.442695, %v275_v25 }
 0x293   :  { %v274_v27 = vpop.xlane.xlu1 %273 }
 0x294   :  { %521 = vpow2.f32 %v277_v26  ;;  %v276_v28 = vsub.f32 %v267_v21, %v274_v27 }
 0x296   :  { %v279_v29 = vmul.f32 1.442695, %v276_v28 }
 0x297   :  { %v292_v30 = vpop.permute.xlu1 %291 }
 0x298   :  { %523 = vpow2.f32 %v279_v29  ;;  %505 = vmatpush3.msra.mxu0 %v292_v30 }
 0x2a1   :  { %v522_v31 = vpop.eup %521 }
 0x2a2   :  { %v281_v32 = vsel %vm268_vm4, %v522_v31, 0.0 }
 0x2a3   :  { %282 = vadd.xlane.f32.xlu0 %v281_v32 }
 0x2a5   :  { %v524_v33 = vpop.eup %523 }
 0x2a6   :  { %v284_v34 = vsel %vm268_vm4, %v524_v33, 0.0 }
 0x2a7   :  { %285 = vadd.xlane.f32.xlu1 %v284_v34 }
 0x2b8   :  { %367 = vrot.lane.b32.xlu1 %v493_v7, %s554_s0 }
 0x32c   :  { %v283_v35 = vpop.xlane.xlu0 %282 }
 0x32d   :  { %525 = vrcp.f32 %v283_v35 }
 0x330   :  { %v286_v36 = vpop.xlane.xlu1 %285 }
 0x331   :  { %527 = vrcp.f32 %v286_v36 }
 0x334   :  { %v368_v37 = vpop.permute.xlu1 %367 }
 0x335   :  { %510 = vmatpush3.msra.mxu1 %v368_v37 }
 0x33a   :  { %v526_v38 = vpop.eup %525 }
 0x33b   :  { %v289_v39 = vmul.f32 %v526_v38, %v522_v31 }
 0x33d   :  { %507 = vmatmul.mubr.msk.f32.vlgmr.msra.gmra.mxu0 %vm268_vm4, %v289_v39 }
 0x33e   :  { %v528_v40 = vpop.eup %527 }
 0x33f   :  { %v290_v41 = vmul.f32 %v528_v40, %v524_v33 }
 0x341   :  { %512 = vmatmul.mubr.msk.f32.vlgmr.msra.gmra.mxu1 %vm268_vm4, %v290_v41 }
 0x3fd   :  { %v363_v42 = vpop.f32.mrf.mxu0 }
 0x3fe   :  { %443 = vst.msk [vmem:[#allocation2] sm:$0xff] %vm105_vm2, %v363_v42 }
 0x3ff   :  { %v508_v43 = vpop.f32.mrf.mxu0 }
 0x401   :  { %v439_v44 = vpop.f32.mrf.mxu1 }
 0x402   :  { %444 = vst.msk [vmem:[#allocation2 + $0x8] sm:$0xff] %vm105_vm2, %v439_v44 }
 0x403   :  { %v513_v45 = vpop.f32.mrf.mxu1 }
 0x404   :  { %540 = shalt.err (!%p537_p4)
}
 0x405   :  { %s556_s24 = smov 128   ;;  %s557_s25 = smov 8  }
 0x406   :  { %456 = dma.vmem_to_hbm [thread:$0]  %s451_s22, 256, %s612_s2, [#allocation3], %s556_s24, %s556_s24, %s557_s25  }
 0x407   :  { %549 = dma.done.wait [#allocation3], 256  }
 0x408   :  { %550 = vsyncadd [#allocation3], 4294967040 }
 0x409   :  { %460 = vsyncpa [#allocation3], 1 }

</bundles_post_ra>
